<compile_context>
chip_gen: v7x
topology: tpu7x:2x2x1
jax: 0.10.0
libtpu: 0.0.40
codegen_flags: <defaults>
</compile_context>

<pallas_src>
import jax
import jax.numpy as jnp
from jax import lax
from jax.experimental import pallas as pl
from jax.experimental.pallas import tpu as pltpu

EPS = 1e-5


# ---------------------------------------------------------------------------
# Fused bottleneck kernel
# ---------------------------------------------------------------------------
def _fused_bottleneck_kernel(x_ref, w1_ref, b1_ref, w2c_ref, b2_ref,
                             w3_ref, b3_ref, o_ref, x1sh_ref):
    """One (batch, row-tile) grid point of the fused bottleneck.

    x_ref   : (1, H, W, Cin)       full image (revisited across row tiles)
    w1_ref  : (Cin, width)         conv1 1x1 weights, BN1 scale folded
    b1_ref  : (1, width)           folded BN1 bias
    w2c_ref : (3, 3*width, width)  conv2 3x3 weights, BN2 scale folded,
                                   the 3 kw taps concatenated along Cin
    b2_ref  : (1, width)
    w3_ref  : (width, Cout)        conv3 1x1 weights, BN3 scale folded
    b3_ref  : (1, Cout)
    o_ref   : (1, TH, W, Cout)
    x1sh_ref: (H+2, W, 3*width)    VMEM scratch: conv1 output, H zero-padded,
                                   with [w-1 | w | w+1] shifted copies packed
                                   along channels. Persists across row tiles,
                                   recomputed at rt == 0.
    """
    rt = pl.program_id(1)
    H, W, cin = x_ref.shape[1], x_ref.shape[2], x_ref.shape[3]
    TH = o_ref.shape[1]
    width = w1_ref.shape[1]
    cout = w3_ref.shape[1]

    @pl.when(rt == 0)
    def _():
        # conv1 (1x1) + BN1 + ReLU over the full image (in VMEM only).
        x2d = x_ref[0].reshape(H * W, cin)
        y1 = jnp.dot(x2d, w1_ref[...], preferred_element_type=jnp.float32)
        y1 = jnp.maximum(y1 + b1_ref[...], 0.0).reshape(H, W, width)

        # Zero halo rows / shifted-out columns, then scatter the three kw-tap
        # copies into disjoint channel blocks: [w-1 | w | w+1].
        x1sh_ref[...] = jnp.zeros_like(x1sh_ref)
        # center tap (column w)
        x1sh_ref[pl.ds(1, H), pl.ds(0, W), pl.ds(width, width)] = y1
        # left tap: output column w reads conv1 column w-1
        x1sh_ref[pl.ds(1, H), pl.ds(1, W - 1), pl.ds(0, width)] = y1[:, :W - 1, :]
        # right tap: output column w reads conv1 column w+1
        x1sh_ref[pl.ds(1, H), pl.ds(0, W - 1), pl.ds(2 * width, width)] = y1[:, 1:, :]

    h0 = pl.multiple_of(rt * TH, TH)
    M = TH * W

    # conv2 (3x3) + BN2 + ReLU: 3 aligned leading-axis slices, K = 3*width.
    acc = jnp.zeros((M, width), jnp.float32)
    for dh in range(3):
        blk = x1sh_ref[pl.ds(h0 + dh, TH)].reshape(M, 3 * width)
        acc = acc + jnp.dot(blk, w2c_ref[dh], preferred_element_type=jnp.float32)
    y2 = jnp.maximum(acc + b2_ref[...], 0.0)

    # conv3 (1x1) + BN3 + residual add + ReLU.
    y3 = jnp.dot(y2, w3_ref[...], preferred_element_type=jnp.float32) + b3_ref[...]
    ident = x_ref[0, pl.ds(h0, TH)].reshape(M, cout).astype(jnp.float32)
    o_ref[0] = jnp.maximum(y3 + ident, 0.0).reshape(TH, W, cout).astype(o_ref.dtype)


# ---------------------------------------------------------------------------
# Wrappers
# ---------------------------------------------------------------------------
def fold_bn(gamma, beta, mean, var):
    scale = gamma / jnp.sqrt(var + EPS)
    bias = beta - mean * scale
    return scale, bias


def bottleneck_forward_nhwc(x_nhwc, params, *, tile_h=8):
    """Pallas fused Bottleneck (stride=1, groups=1, identity shortcut), NHWC."""
    N, H, W, cin = x_nhwc.shape
    assert W >= 2, "spatial width must be >= 2"

    s1, b1 = fold_bn(*params["bn1"])
    s2, b2 = fold_bn(*params["bn2"])
    s3, b3 = fold_bn(*params["bn3"])

    # Fold BN scales into the conv weights (per-output-channel scale on a
    # linear op), leaving only a bias add inside the kernel.
    w1f = params["w1"][0, 0] * s1[None, :]                 # (Cin, width)
    w2f = params["w2"] * s2[None, None, None, :]           # (3, 3, width, width)
    w3f = params["w3"][0, 0] * s3[None, :]                 # (width, Cout)
    width = w1f.shape[1]
    cout = w3f.shape[1]
    if cin != cout:
        # TODO(synk): stride!=1 / downsample shortcut path not implemented.
        raise ValueError("identity shortcut requires inplanes == planes * 4")

    # Concatenate the three kw taps of conv2 along Cin -> (3, 3*width, width),
    # matching the channel packing of the in-kernel scratch.
    w2cat = jnp.concatenate([w2f[:, 0], w2f[:, 1], w2f[:, 2]], axis=1)

    b1 = b1.reshape(1, width)
    b2 = b2.reshape(1, width)
    b3 = b3.reshape(1, cout)

    # Row tile: largest divisor of H that is <= tile_h (bounds VMEM use, sized
    # conservatively for v7x's 64 MiB while keeping output tiles lane-dense).
    th = max(1, min(tile_h, H))
    while H % th:
        th -= 1

    return pl.pallas_call(
        _fused_bottleneck_kernel,
        out_shape=jax.ShapeDtypeStruct((N, H, W, cout), x_nhwc.dtype),
        grid=(N, H // th),
        in_specs=[
            pl.BlockSpec((1, H, W, cin), lambda n, rt: (n, 0, 0, 0)),
            pl.BlockSpec((cin, width), lambda n, rt: (0, 0)),
            pl.BlockSpec((1, width), lambda n, rt: (0, 0)),
            pl.BlockSpec((3, 3 * width, width), lambda n, rt: (0, 0, 0)),
            pl.BlockSpec((1, width), lambda n, rt: (0, 0)),
            pl.BlockSpec((width, cout), lambda n, rt: (0, 0)),
            pl.BlockSpec((1, cout), lambda n, rt: (0, 0)),
        ],
        out_specs=pl.BlockSpec((1, th, W, cout), lambda n, rt: (n, rt, 0, 0)),
        scratch_shapes=[pltpu.VMEM((H + 2, W, 3 * width), jnp.float32)],
        compiler_params=pltpu.CompilerParams(
            dimension_semantics=("parallel", "arbitrary"),
            vmem_limit_bytes=32 * 1024 * 1024,
        ),
    )(x_nhwc, w1f, b1, w2cat, b2, w3f, b3)


def bottleneck_forward(x_nchw, params, *, tile_h=8):
    """NCHW wrapper matching the PyTorch Bottleneck interface.

    NOTE: in a full NHWC network both transposes disappear; they exist only to
    match the PyTorch NCHW calling convention at the boundary.
    """
    x = jnp.transpose(x_nchw, (0, 2, 3, 1))
    out = bottleneck_forward_nhwc(x, params, tile_h=tile_h)
    return jnp.transpose(out, (0, 3, 1, 2))


# ---------------------------------------------------------------------------
# Parameters (synthetic) and pure-JAX reference
# ---------------------------------------------------------------------------
def init_bottleneck_params(key, inplanes, planes, base_width=64, groups=1):
    width = int(planes * (base_width / 64.0)) * groups
    out_planes = planes * 4  # expansion = 4
    ks = jax.random.split(key, 15)

    def bn_params(k0, k1, k2, k3, c):
        gamma = jax.random.uniform(k0, (c,), jnp.float32, 0.5, 1.5)
        beta = 0.1 * jax.random.normal(k1, (c,), jnp.float32)
        mean = 0.1 * jax.random.normal(k2, (c,), jnp.float32)
        var = jax.random.uniform(k3, (c,), jnp.float32, 0.5, 1.5)
        return gamma, beta, mean, var

    params = {
        # conv weights stored HWIO (PyTorch uses OIHW; weights are synthetic)
        "w1": 0.1 * jax.random.normal(ks[0], (1, 1, inplanes, width), jnp.float32),
        "w2": 0.1 * jax.random.normal(ks[1], (3, 3, width, width), jnp.float32),
        "w3": 0.1 * jax.random.normal(ks[2], (1, 1, width, out_planes), jnp.float32),
        "bn1": bn_params(ks[3], ks[4], ks[5], ks[6], width),
        "bn2": bn_params(ks[7], ks[8], ks[9], ks[10], width),
        "bn3": bn_params(ks[11], ks[12], ks[13], ks[14], out_planes),
    }
    return params, width, out_planes


def ref_forward(x_nchw, params):
    x = jnp.transpose(x_nchw, (0, 2, 3, 1))
    dn = ("NHWC", "HWIO", "NHWC")

    def bn(y, p):
        gamma, beta, mean, var = p
        return (y - mean) / jnp.sqrt(var + EPS) * gamma + beta

    out = lax.conv_general_dilated(x, params["w1"], (1, 1), "VALID",
                                   dimension_numbers=dn)
    out = jax.nn.relu(bn(out, params["bn1"]))
    out = lax.conv_general_dilated(out, params["w2"], (1, 1), "SAME",
                                   dimension_numbers=dn)
    out = jax.nn.relu(bn(out, params["bn2"]))
    out = lax.conv_general_dilated(out, params["w3"], (1, 1), "VALID",
                                   dimension_numbers=dn)
    out = bn(out, params["bn3"])
    out = jax.nn.relu(out + x)
    return jnp.transpose(out, (0, 3, 1, 2))


# ---------------------------------------------------------------------------
if __name__ == "__main__":
    key = jax.random.PRNGKey(0)
    k_x, k_p = jax.random.split(key)

    # Small deterministic config: inplanes must equal planes*4 (downsample=None)
    N, inplanes, planes, H, W = 2, 16, 4, 8, 8
    x = jax.random.normal(k_x, (N, inplanes, H, W), jnp.float32)  # NCHW
    params, width, out_planes = init_bottleneck_params(k_p, inplanes, planes)

    # tile_h=4 exercises the multi-row-tile path (grid = (N, 2)).
    out = bottleneck_forward(x, params, tile_h=4)
    out = jax.block_until_ready(out)

    ref = jax.block_until_ready(ref_forward(x, params))
    assert out.shape == (N, out_planes, H, W), out.shape
    if not bool(jnp.allclose(out, ref, atol=1e-4, rtol=1e-4)):
        raise RuntimeError("Pallas Bottleneck output mismatch vs JAX reference")

    print("KERNEL_OK")
</pallas_src>

<mosaic_0001>
module attributes {stable_mosaic.version = 11 : i64} {
  func.func @_fused_bottleneck_kernel(%arg0: i32, %arg1: i32, %arg2: memref<1x8x8x16xf32, #tpu.memory_space<vmem>>, %arg3: memref<16x4xf32, #tpu.memory_space<vmem>>, %arg4: memref<1x4xf32, #tpu.memory_space<vmem>>, %arg5: memref<3x12x4xf32, #tpu.memory_space<vmem>>, %arg6: memref<1x4xf32, #tpu.memory_space<vmem>>, %arg7: memref<4x16xf32, #tpu.memory_space<vmem>>, %arg8: memref<1x16xf32, #tpu.memory_space<vmem>>, %arg9: memref<1x4x8x16xf32, #tpu.memory_space<vmem>>, %arg10: memref<10x8x12xf32, #tpu.memory_space<vmem>>) attributes {dimension_semantics = [#tpu.dimension_semantics<parallel>, #tpu.dimension_semantics<arbitrary>], iteration_bounds = array<i64: 2, 2>, scalar_prefetch = 0 : i64, scratch_operands = 1 : i64, tpu.core_type = #tpu.core_type<tc>, window_params = [{transform_indices = @transform_0, window_bounds = array<i64: 1, 8, 8, 16>}, {pipeline_mode = #tpu.pipeline_mode<synchronous>, transform_indices = @transform_1, window_bounds = array<i64: 16, 4>}, {pipeline_mode = #tpu.pipeline_mode<synchronous>, transform_indices = @transform_2, window_bounds = array<i64: 1, 4>}, {pipeline_mode = #tpu.pipeline_mode<synchronous>, transform_indices = @transform_3, window_bounds = array<i64: 3, 12, 4>}, {pipeline_mode = #tpu.pipeline_mode<synchronous>, transform_indices = @transform_4, window_bounds = array<i64: 1, 4>}, {pipeline_mode = #tpu.pipeline_mode<synchronous>, transform_indices = @transform_5, window_bounds = array<i64: 4, 16>}, {pipeline_mode = #tpu.pipeline_mode<synchronous>, transform_indices = @transform_6, window_bounds = array<i64: 1, 16>}, {transform_indices = @transform_7, window_bounds = array<i64: 1, 4, 8, 16>}]} {
    %c0_i32 = arith.constant 0 : i32
    %0 = arith.cmpi eq, %arg1, %c0_i32 : i32
    %1 = arith.extui %0 : i1 to i32
    %c0_i32_0 = arith.constant 0 : i32
    %2 = arith.cmpi ne, %1, %c0_i32_0 : i32
    scf.if %2 {
      %c0_33 = arith.constant 0 : index
      %c0_34 = arith.constant 0 : index
      %c0_35 = arith.constant 0 : index
      %c0_36 = arith.constant 0 : index
      %51 = vector.load %arg2[%c0_33, %c0_34, %c0_35, %c0_36] : memref<1x8x8x16xf32, #tpu.memory_space<vmem>>, vector<1x8x8x16xf32>
      %52 = vector.shape_cast %51 : vector<1x8x8x16xf32> to vector<8x8x16xf32>
      %53 = vector.shape_cast %52 : vector<8x8x16xf32> to vector<64x16xf32>
      %c0_37 = arith.constant 0 : index
      %c0_38 = arith.constant 0 : index
      %54 = vector.load %arg3[%c0_37, %c0_38] : memref<16x4xf32, #tpu.memory_space<vmem>>, vector<16x4xf32>
      %cst_39 = arith.constant dense<0.000000e+00> : vector<64x4xf32>
      %55 = tpu.matmul %53, %54, %cst_39 {dimension_numbers = #tpu.dot_dimension_numbers<[1], [0], [0], [1], [0, 0, 1, 1], [], []>} : vector<64x16xf32>, vector<16x4xf32>, vector<64x4xf32> -> vector<64x4xf32>
      %c0_40 = arith.constant 0 : index
      %c0_41 = arith.constant 0 : index
      %56 = vector.load %arg4[%c0_40, %c0_41] : memref<1x4xf32, #tpu.memory_space<vmem>>, vector<1x4xf32>
      %57 = vector.broadcast %56 : vector<1x4xf32> to vector<64x4xf32>
      %58 = arith.addf %55, %57 : vector<64x4xf32>
      %cst_42 = arith.constant 0.000000e+00 : f32
      %59 = vector.broadcast %cst_42 : f32 to vector<64x4xf32>
      %60 = arith.maximumf %58, %59 : vector<64x4xf32>
      %61 = vector.shape_cast %60 : vector<64x4xf32> to vector<8x8x4xf32>
      %cst_43 = arith.constant 0.000000e+00 : f32
      %62 = vector.broadcast %cst_43 : f32 to vector<10x8x12xf32>
      %c0_44 = arith.constant 0 : index
      %c0_45 = arith.constant 0 : index
      %c0_46 = arith.constant 0 : index
      %63 = vector.load %arg10[%c0_44, %c0_45, %c0_46] : memref<10x8x12xf32, #tpu.memory_space<vmem>>, vector<10x8x12xf32>
      tpu.vector_store %arg10[%c0_44, %c0_45, %c0_46], %62 {strides = array<i32>} : memref<10x8x12xf32, #tpu.memory_space<vmem>>, vector<10x8x12xf32>,
      %c1_47 = arith.constant 1 : index
      %c0_48 = arith.constant 0 : index
      %c4 = arith.constant 4 : index
      %64 = vector.load %arg10[%c1_47, %c0_48, %c4] : memref<10x8x12xf32, #tpu.memory_space<vmem>>, vector<8x8x4xf32>
      tpu.vector_store %arg10[%c1_47, %c0_48, %c4], %61 {strides = array<i32>} : memref<10x8x12xf32, #tpu.memory_space<vmem>>, vector<8x8x4xf32>,
      %65 = vector.extract_strided_slice %61 {offsets = [0, 0, 0], sizes = [8, 7, 4], strides = [1, 1, 1]} : vector<8x8x4xf32> to vector<8x7x4xf32>
      %c1_49 = arith.constant 1 : index
      %c1_50 = arith.constant 1 : index
      %c0_51 = arith.constant 0 : index
      %66 = vector.load %arg10[%c1_49, %c1_50, %c0_51] : memref<10x8x12xf32, #tpu.memory_space<vmem>>, vector<8x7x4xf32>
      tpu.vector_store %arg10[%c1_49, %c1_50, %c0_51], %65 {strides = array<i32>} : memref<10x8x12xf32, #tpu.memory_space<vmem>>, vector<8x7x4xf32>,
      %67 = vector.extract_strided_slice %61 {offsets = [0, 1, 0], sizes = [8, 7, 4], strides = [1, 1, 1]} : vector<8x8x4xf32> to vector<8x7x4xf32>
      %c1_52 = arith.constant 1 : index
      %c0_53 = arith.constant 0 : index
      %c8 = arith.constant 8 : index
      %68 = vector.load %arg10[%c1_52, %c0_53, %c8] : memref<10x8x12xf32, #tpu.memory_space<vmem>>, vector<8x7x4xf32>
      tpu.vector_store %arg10[%c1_52, %c0_53, %c8], %67 {strides = array<i32>} : memref<10x8x12xf32, #tpu.memory_space<vmem>>, vector<8x7x4xf32>,
    } else {
    }
    %c4_i32 = arith.constant 4 : i32
    %3 = arith.muli %arg1, %c4_i32 : i32
    %4 = tpu.assume_multiple %3, 4 : i32
    %cst = arith.constant 0.000000e+00 : f32
    %5 = vector.broadcast %cst : f32 to vector<32x4xf32>
    %c0_i32_1 = arith.constant 0 : i32
    %6 = arith.addi %4, %c0_i32_1 : i32
    %7 = arith.index_cast %6 : i32 to index
    %c0 = arith.constant 0 : index
    %c0_2 = arith.constant 0 : index
    %8 = vector.load %arg10[%7, %c0, %c0_2] : memref<10x8x12xf32, #tpu.memory_space<vmem>>, vector<4x8x12xf32>
    %9 = vector.shape_cast %8 : vector<4x8x12xf32> to vector<32x12xf32>
    %c0_3 = arith.constant 0 : index
    %c0_4 = arith.constant 0 : index
    %c0_5 = arith.constant 0 : index
    %10 = vector.load %arg5[%c0_3, %c0_4, %c0_5] : memref<3x12x4xf32, #tpu.memory_space<vmem>>, vector<1x12x4xf32>
    %11 = vector.shape_cast %10 : vector<1x12x4xf32> to vector<12x4xf32>
    %cst_6 = arith.constant dense<0.000000e+00> : vector<32x4xf32>
    %12 = tpu.matmul %9, %11, %cst_6 {dimension_numbers = #tpu.dot_dimension_numbers<[1], [0], [0], [1], [0, 0, 1, 1], [], []>} : vector<32x12xf32>, vector<12x4xf32>, vector<32x4xf32> -> vector<32x4xf32>
    %13 = arith.addf %5, %12 : vector<32x4xf32>
    %c1_i32 = arith.constant 1 : i32
    %14 = arith.addi %4, %c1_i32 : i32
    %15 = arith.index_cast %14 : i32 to index
    %c0_7 = arith.constant 0 : index
    %c0_8 = arith.constant 0 : index
    %16 = vector.load %arg10[%15, %c0_7, %c0_8] : memref<10x8x12xf32, #tpu.memory_space<vmem>>, vector<4x8x12xf32>
    %17 = vector.shape_cast %16 : vector<4x8x12xf32> to vector<32x12xf32>
    %c1 = arith.constant 1 : index
    %c0_9 = arith.constant 0 : index
    %c0_10 = arith.constant 0 : index
    %18 = vector.load %arg5[%c1, %c0_9, %c0_10] : memref<3x12x4xf32, #tpu.memory_space<vmem>>, vector<1x12x4xf32>
    %19 = vector.shape_cast %18 : vector<1x12x4xf32> to vector<12x4xf32>
    %cst_11 = arith.constant dense<0.000000e+00> : vector<32x4xf32>
    %20 = tpu.matmul %17, %19, %cst_11 {dimension_numbers = #tpu.dot_dimension_numbers<[1], [0], [0], [1], [0, 0, 1, 1], [], []>} : vector<32x12xf32>, vector<12x4xf32>, vector<32x4xf32> -> vector<32x4xf32>
    %21 = arith.addf %13, %20 : vector<32x4xf32>
    %c2_i32 = arith.constant 2 : i32
    %22 = arith.addi %4, %c2_i32 : i32
    %23 = arith.index_cast %22 : i32 to index
    %c0_12 = arith.constant 0 : index
    %c0_13 = arith.constant 0 : index
    %24 = vector.load %arg10[%23, %c0_12, %c0_13] : memref<10x8x12xf32, #tpu.memory_space<vmem>>, vector<4x8x12xf32>
    %25 = vector.shape_cast %24 : vector<4x8x12xf32> to vector<32x12xf32>
    %c2 = arith.constant 2 : index
    %c0_14 = arith.constant 0 : index
    %c0_15 = arith.constant 0 : index
    %26 = vector.load %arg5[%c2, %c0_14, %c0_15] : memref<3x12x4xf32, #tpu.memory_space<vmem>>, vector<1x12x4xf32>
    %27 = vector.shape_cast %26 : vector<1x12x4xf32> to vector<12x4xf32>
    %cst_16 = arith.constant dense<0.000000e+00> : vector<32x4xf32>
    %28 = tpu.matmul %25, %27, %cst_16 {dimension_numbers = #tpu.dot_dimension_numbers<[1], [0], [0], [1], [0, 0, 1, 1], [], []>} : vector<32x12xf32>, vector<12x4xf32>, vector<32x4xf32> -> vector<32x4xf32>
    %29 = arith.addf %21, %28 : vector<32x4xf32>
    %c0_17 = arith.constant 0 : index
    %c0_18 = arith.constant 0 : index
    %30 = vector.load %arg6[%c0_17, %c0_18] : memref<1x4xf32, #tpu.memory_space<vmem>>, vector<1x4xf32>
    %31 = vector.broadcast %30 : vector<1x4xf32> to vector<32x4xf32>
    %32 = arith.addf %29, %31 : vector<32x4xf32>
    %cst_19 = arith.constant 0.000000e+00 : f32
    %33 = vector.broadcast %cst_19 : f32 to vector<32x4xf32>
    %34 = arith.maximumf %32, %33 : vector<32x4xf32>
    %c0_20 = arith.constant 0 : index
    %c0_21 = arith.constant 0 : index
    %35 = vector.load %arg7[%c0_20, %c0_21] : memref<4x16xf32, #tpu.memory_space<vmem>>, vector<4x16xf32>
    %cst_22 = arith.constant dense<0.000000e+00> : vector<32x16xf32>
    %36 = tpu.matmul %34, %35, %cst_22 {dimension_numbers = #tpu.dot_dimension_numbers<[1], [0], [0], [1], [0, 0, 1, 1], [], []>} : vector<32x4xf32>, vector<4x16xf32>, vector<32x16xf32> -> vector<32x16xf32>
    %c0_23 = arith.constant 0 : index
    %c0_24 = arith.constant 0 : index
    %37 = vector.load %arg8[%c0_23, %c0_24] : memref<1x16xf32, #tpu.memory_space<vmem>>, vector<1x16xf32>
    %38 = vector.broadcast %37 : vector<1x16xf32> to vector<32x16xf32>
    %39 = arith.addf %36, %38 : vector<32x16xf32>
    %c0_25 = arith.constant 0 : index
    %40 = arith.index_cast %4 : i32 to index
    %c0_26 = arith.constant 0 : index
    %c0_27 = arith.constant 0 : index
    %41 = vector.load %arg2[%c0_25, %40, %c0_26, %c0_27] : memref<1x8x8x16xf32, #tpu.memory_space<vmem>>, vector<1x4x8x16xf32>
    %42 = vector.shape_cast %41 : vector<1x4x8x16xf32> to vector<4x8x16xf32>
    %43 = vector.shape_cast %42 : vector<4x8x16xf32> to vector<32x16xf32>
    %44 = arith.addf %39, %43 : vector<32x16xf32>
    %cst_28 = arith.constant 0.000000e+00 : f32
    %45 = vector.broadcast %cst_28 : f32 to vector<32x16xf32>
    %46 = arith.maximumf %44, %45 : vector<32x16xf32>
    %47 = vector.shape_cast %46 : vector<32x16xf32> to vector<4x8x16xf32>
    %c0_29 = arith.constant 0 : index
    %c0_30 = arith.constant 0 : index
    %c0_31 = arith.constant 0 : index
    %c0_32 = arith.constant 0 : index
    %48 = vector.load %arg9[%c0_29, %c0_30, %c0_31, %c0_32] : memref<1x4x8x16xf32, #tpu.memory_space<vmem>>, vector<1x4x8x16xf32>
    %49 = vector.shape_cast %48 : vector<1x4x8x16xf32> to vector<4x8x16xf32>
    %50 = vector.shape_cast %47 : vector<4x8x16xf32> to vector<1x4x8x16xf32>
    tpu.vector_store %arg9[%c0_29, %c0_30, %c0_31, %c0_32], %50 {strides = array<i32>} : memref<1x4x8x16xf32, #tpu.memory_space<vmem>>, vector<1x4x8x16xf32>,
    return
  }
  func.func @transform_0(%arg0: i32, %arg1: i32) -> (i32, i32, i32, i32) {
    %c0_i32 = arith.constant 0 : i32
    %c0_i32_0 = arith.constant 0 : i32
    %c0_i32_1 = arith.constant 0 : i32
    %c0_i32_2 = arith.constant 0 : i32
    return %arg0, %c0_i32, %c0_i32_0, %c0_i32_1 : i32, i32, i32, i32
  }
  func.func @transform_1(%arg0: i32, %arg1: i32) -> (i32, i32) {
    %c0_i32 = arith.constant 0 : i32
    %c0_i32_0 = arith.constant 0 : i32
    %c0_i32_1 = arith.constant 0 : i32
    return %c0_i32, %c0_i32_0 : i32, i32
  }
  func.func @transform_2(%arg0: i32, %arg1: i32) -> (i32, i32) {
    %c0_i32 = arith.constant 0 : i32
    %c0_i32_0 = arith.constant 0 : i32
    %c0_i32_1 = arith.constant 0 : i32
    return %c0_i32, %c0_i32_0 : i32, i32
  }
  func.func @transform_3(%arg0: i32, %arg1: i32) -> (i32, i32, i32) {
    %c0_i32 = arith.constant 0 : i32
    %c0_i32_0 = arith.constant 0 : i32
    %c0_i32_1 = arith.constant 0 : i32
    %c0_i32_2 = arith.constant 0 : i32
    return %c0_i32, %c0_i32_0, %c0_i32_1 : i32, i32, i32
  }
  func.func @transform_4(%arg0: i32, %arg1: i32) -> (i32, i32) {
    %c0_i32 = arith.constant 0 : i32
    %c0_i32_0 = arith.constant 0 : i32
    %c0_i32_1 = arith.constant 0 : i32
    return %c0_i32, %c0_i32_0 : i32, i32
  }
  func.func @transform_5(%arg0: i32, %arg1: i32) -> (i32, i32) {
    %c0_i32 = arith.constant 0 : i32
    %c0_i32_0 = arith.constant 0 : i32
    %c0_i32_1 = arith.constant 0 : i32
    return %c0_i32, %c0_i32_0 : i32, i32
  }
  func.func @transform_6(%arg0: i32, %arg1: i32) -> (i32, i32) {
    %c0_i32 = arith.constant 0 : i32
    %c0_i32_0 = arith.constant 0 : i32
    %c0_i32_1 = arith.constant 0 : i32
    return %c0_i32, %c0_i32_0 : i32, i32
  }
  func.func @transform_7(%arg0: i32, %arg1: i32) -> (i32, i32, i32, i32) {
    %c0_i32 = arith.constant 0 : i32
    %c0_i32_0 = arith.constant 0 : i32
    %c0_i32_1 = arith.constant 0 : i32
    return %arg0, %arg1, %c0_i32, %c0_i32_0 : i32, i32, i32, i32
  }
}

</mosaic_0001>

<bundles_post_ra>
// kernel: tpu_custom_call.1
= control target key start
LH: loop header
LB: loop body
LE: loop exit
PB: predicated region body
PF: predicated region fallthrough
CT: control target
= control target key end

     0   :  { %s2014_s0 = inlined_call_operand.hbm [shape: f32[2,8,8,16], index: 0, kind: input, shape index: {}]   ;;  %s2015_s1 = inlined_call_operand.vmem [shape: f32[16,4], index: 1, kind: input, shape index: {}]   ;;  %s2016_s2 = inlined_call_operand.vmem [shape: f32[1,4], index: 2, kind: input, shape index: {}]   ;;  %s2017_s3 = inlined_call_operand.vmem [shape: f32[3,12,4], index: 3, kind: input, shape index: {}]   ;;  %s2018_s4 = inlined_call_operand.vmem [shape: f32[1,4], index: 4, kind: input, shape index: {}]   ;;  %s2019_s5 = inlined_call_operand.vmem [shape: f32[4,16], index: 5, kind: input, shape index: {}]   ;;  %s2020_s6 = inlined_call_operand.vmem [shape: f32[1,16], index: 6, kind: input, shape index: {}]   ;;  %s2021_s7 = inlined_call_operand.hbm [shape: f32[2,8,8,16], index: 7, kind: output, shape index: {}]  }
   0x1   :  { %2028 = sst [smem:[#allocation13_spill]] %s2021_s7 }
   0x2   :  { %12 = vsyncpa [#allocation4], 0 }
   0x3   :  { %14 = vsyncpa [#allocation4 + $0x1], 0 }
   0x4   :  { %15 = vsyncpa [#allocation5], 0 }
   0x5   :  { %17 = vsyncpa [#allocation5 + $0x1], 0  ;;  %s1661_s24 = smov 0   ;;  %s1663_s25 = smov 0  }
   0x6   :  { %s1665_s26 = smov 0   ;;  %s1667_s27 = smov 0  }
   0x7   :  { %s1669_s28 = smov 0   ;;  %s1671_s29 = smov 0  }
   0x8   :  { %s1673_s30 = smov 0   ;;  %s1675_s8 = smov 0  }
   0x9   :  { %s1677_s9 = smov 0   ;;  %s1679_s10 = smov 0  }
   0xa   :  { %s1681_s11 = smov 0  }
   0xb LB: > { %2029 = sst [smem:[#allocation9_spill]] %s1601_s9  ;;  %s1158_s12 = sadd.s32 4294967295, %s1609_s11   ;;  %s1609_s11 = sphi %s1681_s11, %s23_s11   ;;  %s1605_s10 = sphi %s1679_s10, %s2048_s10   ;;  %s1601_s9 = sphi %s1677_s9, %s2047_s9   ;;  %s1597_s8 = sphi %s1675_s8, %s2046_s8   ;;  %s1593_s30 = sphi %s1673_s30, %s2045_s30   ;;  %s1589_s29 = sphi %s1671_s29, %s2054_s29   ;;  %s1585_s28 = sphi %s1669_s28, %s2053_s28   ;;  %s1581_s27 = sphi %s1667_s27, %s2052_s27   ;;  %s1577_s26 = sphi %s1665_s26, %s2051_s26   ;;  %s1573_s25 = sphi %s1663_s25, %s2050_s25   ;;  %s1569_s24 = sphi %s1661_s24, %s2049_s24  }
   0xc   : > { %2030 = sst [smem:[#allocation10_spill]] %s1605_s10  ;;  %s1159_s13 = sadd.s32 4294967294, %s1609_s11  }
   0xd   : > { %s32_s14 = sadd.s32 1, %s1601_s9  ;;  %s35_s15 = sadd.s32 1, %s1605_s10 }
   0xe   : > { %p33_p0 = scmp.ge.s32.totalorder %s32_s14, 2  ;;  %s42_s16 = sadd.s32 1, %s1589_s29 }
   0xf   : > { %p49_p1 = scmp.ne.s32.totalorder %s1589_s29, %s1585_s28  ;;  %p50_p2 = scmp.eq.s32.totalorder %s1609_s11, 0 }
  0x10   : > { %s2056_s14 = smov (%p33_p0, %s32_s14), 0  ;;  %s2058_s15 = smov (!%p33_p0, %s35_s15), %s1605_s10 }
  0x11   : > { %2031 = sst [smem:[#allocation11_spill]] %s2056_s14  ;;  %p1725_p3 = por %p50_p2, %p49_p1 }
  0x12   : > { %p55_p4 = scmp.ne.s32.totalorder %s1585_s28, %s1581_s27  ;;  %p37_p5 = scmp.ge.s32.totalorder %s2058_s15, 2 }
  0x13   : > { %p56_p6 = scmp.eq.s32.totalorder %s1158_s12, 0  ;;  %s192_s18 = ssub.s32 %s1601_s9, %s2056_s14 }
  0x14   : > { %s196_s19 = sadd.s32 1, %s1577_s26  ;;  %s2060_s15 = smov (%p37_p5, %s2058_s15), 0 }
  0x15   : > { %2033 = sst [smem:[#allocation12_spill]] %s2060_s15  ;;  %p1735_p7 = por %p56_p6, %p55_p4 }
  0x16   : > { %p206_p8 = scmp.ne.s32.totalorder %s1577_s26, %s1573_s25  ;;  %s39_s21 = ssub.s32 %s1605_s10, %s2060_s15 }
  0x17   : > { %p207_p9 = scmp.eq.s32.totalorder %s1158_s12, 3  ;;  %p40_p10 = scmp.eq.s32.totalorder %s39_s21, 0 }
  0x18   : > { %s193_s22 = sor.u32 %s192_s18, %s39_s21  ;;  %p212_p13 = scmp.ne.s32.totalorder %s1573_s25, %s1569_s24 }
  0x19   : > { %p194_p11 = scmp.eq.s32.totalorder %s193_s22, 0  ;;  %p1743_p12 = por %p207_p9, %p206_p8 }
  0x1a   : > { %s1748_s27 = scalar_select %p40_p10, %s1589_s29, %s42_s16  }
  0x1b   : > { %s2035_s23 = scalar_select %p1743_p12, 1, 0 }
  0x1c   : > { %s1751_s14 = scalar_select %p194_p11, %s1577_s26, %s196_s19  }
  0x1d   : > { %p213_p0 = scmp.eq.s32.totalorder %s1159_s13, 3  ;;  %p1359_p1 = scmp.lt.s32.totalorder %s1609_s11, 4 }
  0x1e   : > { %s251_s12 = sand.u32 1, %s1589_s29   ;;  %s1224_s21 = sshll.u32 %s1605_s10, 10 }
  0x1f   : > { %p1756_p2 = por %p213_p0, %p212_p13  ;;  %s1162_s18 = sshll.u32 %s251_s12, 6 }
  0x20   : > { %s1765_s7 = scalar_lea.hbm %s2014_s0, %s1224_s21  ;;  %s255_s16 = scalar_lea.vmem [#allocation3], %s1162_s18 }
  0x21   : > { %s2036_s9 = scalar_select %p1756_p2, 1, 0 }
  0x22   : > { %s262_s19 = sshll.u32 %s255_s16, 4  ;;  %p1771_p4 = pnand %p1359_p1, %p1725_p3  ;;  %s1767_s19 = int_to_ptr.vmem [resolvable:$true] %s262_s19 }
  0x23   : > { %s1776_s10 = scalar_lea.sflag [#allocation4], %s251_s12  ;;  %s1457_s15 = scalar_lea.hbm %s1765_s7, 1024 }
  0x24   : > { %p1458_p6 = scmp.ne.s32.totalorder %s1765_s7, %s1457_s15  ;;  %p1459_p8 = pneg %p1771_p4 }
  0x25   : > { %s1462_s17 = scalar_lea.hbm %s2014_s0, 2048  ;;  %p1463_p3 = scmp.lt.u32.totalorder %s1765_s7, %s2014_s0 }
  0x26   : > { %p1460_p9 = pnand %p1459_p8, %p1458_p6  ;;  %p1464_p11 = scmp.lt.u32.totalorder %s1462_s17, %s1457_s15 }
  0x27   : > { %p1466_p0 = scmp.lt.u32.totalorder %s1457_s15, %s1765_s7 }
  0x28   : > { %p1461_p10 = pneg %p1460_p9  ;;  %p1465_p13 = por %p1464_p11, %p1463_p3 }
  0x2a   : > { %p1467_p1 = por %p1466_p0, %p1465_p13 }
  0x2c   : > { %p1468_p5 = pnand %p1467_p1, %p1461_p10 }
  0x2e   : > { %1471 = shalt.err (!%p1468_p5)
}
  0x2f   : > { %s1472_s12 = scalar_lea.vmem %s1767_s19, 1024  ;;  %s1611_s18 = smov [#allocation3]  }
  0x30   : > { %p1473_p6 = scmp.ne.s32.totalorder %s1767_s19, %s1472_s12  ;;  %s1477_s21 = sshll.u32 %s1611_s18, 4  ;;  %s1478_s21 = int_to_ptr.vmem [resolvable:$false] %s1477_s21 }
  0x31   : > { %s1479_s22 = scalar_lea.vmem %s1478_s21, 2048  ;;  %p1480_p12 = scmp.lt.s32.totalorder %s1767_s19, %s1478_s21 }
  0x32   : > { %p1475_p9 = pnand %p1473_p6, %p1459_p8  ;;  %p1481_p3 = scmp.lt.s32.totalorder %s1479_s22, %s1472_s12 }
  0x34   : > { %p1476_p2 = pneg %p1475_p9  ;;  %p1482_p11 = por %p1481_p3, %p1480_p12 }
  0x36   : > { %p1483_p13 = pnand %p1482_p11, %p1476_p2 }
  0x38   : > { %1486 = shalt.err (!%p1483_p13)
}
  0x39   : > { %s1612_s15 = smov 128   ;;  %s1613_s17 = smov 8  }
  0x3a   : > { %1354 = dma.hbm_to_vmem [thread:$0]  (!%p1771_p4), %s1765_s7, 1024, %s1767_s19, %s1776_s10, %s1612_s15, %s1612_s15, %s1613_s17  }
  0x3b   : > { %p270_p5 = scmp.lt.s32.totalorder %s1609_s11, 5  ;;  %p2038_p8 = scmp.ge.s32.totalorder %s1609_s11, 1 }
  0x3d   : > { %p271_p10 = pnand %p2038_p8, %p270_p5 }
  0x3e   : > { %s276_s16 = sand.u32 (!%p271_p10), 1, %s1585_s28  }
  0x3f   : > { %274 = sbr.rel (%p271_p10) target bundleno = 913 (0x391), region = 48  ;;  %s1166_s12 = sshll.u32 (!%p271_p10), %s276_s16, 6 }
  0x40   : > { %s277_s18 = scalar_lea.sflag (!%p271_p10), [#allocation4], %s276_s16  ;;  %s1808_s21 = scalar_lea.vmem (!%p271_p10), [#allocation3], %s1166_s12 }
  0x46   : > { %1560 = dma.done.wait (%p1735_p7), %s277_s18, 1024  }
  0x47   : > { %1562 = vsyncadd (%p1735_p7), %s277_s18, 4294966272  ;;  %s308_s13 = sand.u32 1, %s1573_s25   ;;  %p1168_p12 = scmp.ne.s32.totalorder %s1593_s30, 0 }
  0x48   : > { %s1167_s7 = sshll.u32 %s308_s13, 5  ;;  %v324_v0 = vld [vmem:[%s2015_s1] sm:$0xff] (!%p1168_p12)  ;;  %v325_v1 = vld [vmem:[%s2015_s1 + $0x8] sm:$0xff] (!%p1168_p12)  ;;  %v316_v2 = vld [vmem:[%s1808_s21] sm:$0xff] (!%p1168_p12)  ;;  %vm333_vm0 = vcmask (!%p1168_p12), 130048   ;;  %vm471_vm1 = vcmask (!%p1168_p12), 97280  }
  0x49   : > { %s1817_s10 = scalar_lea.vmem [#allocation6], %s1167_s7  ;;  %315 = sbr.rel (%p1168_p12) target bundleno = 439 (0x1b7), region = 56  ;;  %v1315_v3 = vpack.c.bf16 (!%p1168_p12), %v325_v1, %v324_v0  ;;  %1265 = vmatprep.mubr.msk.f32.mxu0 (!%p1168_p12), %vm333_vm0, %v316_v2  ;;  %v320_v4 = vld [vmem:[%s1808_s21 + $0x20] sm:$0xff] (!%p1168_p12)  ;;  %v317_v5 = vld [vmem:[%s1808_s21 + $0x8] sm:$0xff] (!%p1168_p12)  ;;  %v318_v7 = vld [vmem:[%s1808_s21 + $0x10] sm:$0xff] (!%p1168_p12)  ;;  %v1614_v11 = vmov (!%p1168_p12), 0.0  }
  0x4a   : > { %1271 = vmatprep.mubr.msk.f32.mxu1 (!%p1168_p12), %vm333_vm0, %v320_v4  ;;  %v321_v6 = vld [vmem:[%s1808_s21 + $0x28] sm:$0xff] (!%p1168_p12)  ;;  %v322_v8 = vld [vmem:[%s1808_s21 + $0x30] sm:$0xff] (!%p1168_p12)  ;;  %v319_v9 = vld [vmem:[%s1808_s21 + $0x18] sm:$0xff] (!%p1168_p12)  ;;  %472 = vst.msk [vmem:[#allocation2] sm:$0xff] (!%p1168_p12), %vm471_vm1, %v1614_v11  ;;  %s1615_s12 = smov (!%p1168_p12), 4   ;;  %s1616_s18 = smov (!%p1168_p12), 8  }
  0x4b   : > { %1316 = vmatprep.subr.bf16.mxu0 (!%p1168_p12), %v1315_v3  ;;  %1337 = vmatprep.subr.bf16.mxu1 (!%p1168_p12), %v1315_v3  ;;  %v323_v10 = vld [vmem:[%s1808_s21 + $0x38] sm:$0xff] (!%p1168_p12)  ;;  %478 = vst.msk [vmem:[#allocation2 + $0x30] sm:$0xff] (!%p1168_p12), %vm471_vm1, %v1614_v11  ;;  %481 = vst.msk [vmem:[#allocation2 + $0x48] sm:$0xff] (!%p1168_p12), %vm471_vm1, %v1614_v11  ;;  %v1169_v12 = vld [vmem:[%s2016_s2] ss:$0 sm:$0xff] (!%p1168_p12)  ;;  %vm515_vm2 = vcmask (!%p1168_p12), 64544  }
  0x4c   : > { %1318 = vmatpush3.bf16.msra.mxu0 (!%p1168_p12), %v1315_v3  ;;  %1338 = vmatpush3.bf16.msra.mxu1 (!%p1168_p12), %v1315_v3  ;;  %473 = vst.msk [vmem:[#allocation2 + $0x8] sm:$0xff] (!%p1168_p12), %vm471_vm1, %v1614_v11  ;;  %474 = vst.msk [vmem:[#allocation2 + $0x10] sm:$0xff] (!%p1168_p12), %vm471_vm1, %v1614_v11  ;;  %vm524_vm3 = vcmask (!%p1168_p12), 30720   ;;  %vm557_vm4 = vcmask (!%p1168_p12), 97345  }
  0x4d   : > { %475 = vst.msk [vmem:[#allocation2 + $0x18] sm:$0xff] (!%p1168_p12), %vm471_vm1, %v1614_v11  ;;  %476 = vst.msk [vmem:[#allocation2 + $0x20] sm:$0xff] (!%p1168_p12), %vm471_vm1, %v1614_v11 }
  0x4e   : > { %477 = vst.msk [vmem:[#allocation2 + $0x28] sm:$0xff] (!%p1168_p12), %vm471_vm1, %v1614_v11  ;;  %479 = vst.msk [vmem:[#allocation2 + $0x38] sm:$0xff] (!%p1168_p12), %vm471_vm1, %v1614_v11 }
  0x4f   : > { %1266 = vmatmul.mubr.msk.f32.vlgmr.msra.gmra.mrb[0].mxu0 (!%p1168_p12), %vm333_vm0, %v317_v5  ;;  %1272 = vmatmul.mubr.msk.f32.vlgmr.msra.gmra.mrb[0].mxu1 (!%p1168_p12), %vm333_vm0, %v321_v6  ;;  %480 = vst.msk [vmem:[#allocation2 + $0x40] sm:$0xff] (!%p1168_p12), %vm471_vm1, %v1614_v11 }
  0x50   : > { %1268 = vmatprep.mubr.msk.f32.mxu0 %vm333_vm0, %v318_v7  ;;  %1274 = vmatprep.mubr.msk.f32.mxu1 %vm333_vm0, %v322_v8 }
  0x53   : > { %1269 = vmatmul.mubr.msk.f32.gmra.mrb[2].mxu0 %vm333_vm0, %v319_v9  ;;  %1275 = vmatmul.mubr.msk.f32.gmra.mrb[2].mxu1 %vm333_vm0, %v323_v10 }
 0x122   : > { %v1267_v13 = vpop.f32.mrb[0].mxu0  ;;  %v1273_v14 = vpop.f32.mrb[0].mxu1 }
 0x123   : > { %v430_v15 = vadd.f32 %v1267_v13, %v1169_v12  ;;  %v450_v16 = vadd.f32 %v1273_v14, %v1169_v12  ;;  %v424_v17 = vpop.f32.mrb[1].mxu0  ;;  %v444_v18 = vpop.f32.mrb[1].mxu1 }
 0x124   : > { %v425_v21 = vadd.f32 %v1169_v12, %v424_v17  ;;  %v445_v27 = vadd.f32 %v1169_v12, %v444_v18 }
 0x125   : > { %v464_v19 = vmax.f32 %v430_v15, 0.0  ;;  %v468_v20 = vmax.f32 %v450_v16, 0.0 }
 0x126   : > { %v1270_v22 = vpop.f32.mrb[2].mxu0  ;;  %v1276_v23 = vpop.f32.mrb[2].mxu1  ;;  %v463_v26 = vmax.f32 %v425_v21, 0.0  ;;  %v467_v29 = vmax.f32 %v445_v27, 0.0 }
 0x127   : > { %500 = vrot.lane.b32.xlu1 %v468_v20, %s1615_s12  ;;  %492 = vrot.lane.b32.xlu0 %v464_v19, %s1615_s12  ;;  %v434_v24 = vpop.f32.mrb[3].mxu0  ;;  %v454_v25 = vpop.f32.mrb[3].mxu1  ;;  %v440_v28 = vadd.f32 %v1270_v22, %v1169_v12  ;;  %v460_v31 = vadd.f32 %v1276_v23, %v1169_v12 }
 0x128   : > { %v455_v33 = vadd.f32 %v1169_v12, %v454_v25  ;;  %v435_v34 = vadd.f32 %v1169_v12, %v434_v24 }
 0x129   : > { %v466_v30 = vmax.f32 %v440_v28, 0.0  ;;  %v470_v32 = vmax.f32 %v460_v31, 0.0 }
 0x12a   : > { %v469_v35 = vmax.f32 %v455_v33, 0.0  ;;  %v465_v36 = vmax.f32 %v435_v34, 0.0 }
 0x12b   : > { %535 = vrot.lane.b32.xlu1 %v464_v19, %s1616_s18  ;;  %490 = vrot.lane.b32.xlu0 %v463_v26, %s1615_s12 }
 0x12f   : > { %543 = vrot.lane.b32.xlu1 %v468_v20, %s1616_s18  ;;  %498 = vrot.lane.b32.xlu0 %v467_v29, %s1615_s12 }
 0x133   : > { %496 = vrot.lane.b32.xlu1 %v466_v30, %s1615_s12  ;;  %533 = vrot.lane.b32.xlu0 %v463_v26, %s1616_s18 }
 0x137   : > { %504 = vrot.lane.b32.xlu1 %v470_v32, %s1615_s12  ;;  %541 = vrot.lane.b32.xlu0 %v467_v29, %s1616_s18 }
 0x13b   : > { %539 = vrot.lane.b32.xlu1 %v466_v30, %s1616_s18  ;;  %502 = vrot.lane.b32.xlu0 %v469_v35, %s1615_s12 }
 0x13f   : > { %494 = vrot.lane.b32.xlu1 %v465_v36, %s1615_s12  ;;  %537 = vrot.lane.b32.xlu0 %v465_v36, %s1616_s18 }
 0x143   : > { %547 = vrot.lane.b32.xlu1 %v470_v32, %s1616_s18  ;;  %545 = vrot.lane.b32.xlu0 %v469_v35, %s1616_s18 }
 0x199   : > { %v501_v37 = vpop.permute.xlu1 %500  ;;  %v493_v38 = vpop.permute.xlu0 %492 }
 0x19a   : > { %521 = vst.msk [vmem:[#allocation2 + $0x30] sm:$0xff] %vm515_vm2, %v501_v37  ;;  %517 = vst.msk [vmem:[#allocation2 + $0x10] sm:$0xff] %vm515_vm2, %v493_v38 }
 0x19b   : > { %530 = vst.msk [vmem:[#allocation2 + $0x31] sm:$0x7f] %vm524_vm3, %v468_v20  ;;  %526 = vst.msk [vmem:[#allocation2 + $0x11] sm:$0x7f] %vm524_vm3, %v464_v19 }
 0x19d   : > { %v536_v39 = vpop.permute.xlu1 %535  ;;  %v491_v40 = vpop.permute.xlu0 %490 }
 0x19e   : > { %559 = vst.msk [vmem:[#allocation2 + $0xf] sm:$0xfe] %vm557_vm4, %v536_v39 }
 0x19f   : > { %516 = vst.msk [vmem:[#allocation2 + $0x8] sm:$0xff] %vm515_vm2, %v491_v40 }
 0x1a0   : > { %525 = vst.msk [vmem:[#allocation2 + $0x9] sm:$0x7f] %vm524_vm3, %v463_v26 }
 0x1a1   : > { %v544_v41 = vpop.permute.xlu1 %543  ;;  %v499_v42 = vpop.permute.xlu0 %498 }
 0x1a2   : > { %563 = vst.msk [vmem:[#allocation2 + $0x2f] sm:$0xfe] %vm557_vm4, %v544_v41 }
 0x1a3   : > { %520 = vst.msk [vmem:[#allocation2 + $0x28] sm:$0xff] %vm515_vm2, %v499_v42 }
 0x1a4   : > { %529 = vst.msk [vmem:[#allocation2 + $0x29] sm:$0x7f] %vm524_vm3, %v467_v29 }
 0x1a5   : > { %v497_v43 = vpop.permute.xlu1 %496  ;;  %v534_v44 = vpop.permute.xlu0 %533 }
 0x1a6   : > { %519 = vst.msk [vmem:[#allocation2 + $0x20] sm:$0xff] %vm515_vm2, %v497_v43 }
 0x1a7   : > { %558 = vst.msk [vmem:[#allocation2 + $0x7] sm:$0xfe] %vm557_vm4, %v534_v44 }
 0x1a8   : > { %528 = vst.msk [vmem:[#allocation2 + $0x21] sm:$0x7f] %vm524_vm3, %v466_v30 }
 0x1a9   : > { %v505_v45 = vpop.permute.xlu1 %504  ;;  %v542_v46 = vpop.permute.xlu0 %541 }
 0x1aa   : > { %523 = vst.msk [vmem:[#allocation2 + $0x40] sm:$0xff] %vm515_vm2, %v505_v45 }
 0x1ab   : > { %562 = vst.msk [vmem:[#allocation2 + $0x27] sm:$0xfe] %vm557_vm4, %v542_v46 }
 0x1ac   : > { %532 = vst.msk [vmem:[#allocation2 + $0x41] sm:$0x7f] %vm524_vm3, %v470_v32 }
 0x1ad   : > { %v540_v47 = vpop.permute.xlu1 %539  ;;  %v503_v48 = vpop.permute.xlu0 %502 }
 0x1ae   : > { %561 = vst.msk [vmem:[#allocation2 + $0x1f] sm:$0xfe] %vm557_vm4, %v540_v47 }
 0x1af   : > { %522 = vst.msk [vmem:[#allocation2 + $0x38] sm:$0xff] %vm515_vm2, %v503_v48 }
 0x1b0   : > { %531 = vst.msk [vmem:[#allocation2 + $0x39] sm:$0x7f] %vm524_vm3, %v469_v35 }
 0x1b1   : > { %v495_v49 = vpop.permute.xlu1 %494  ;;  %v538_v50 = vpop.permute.xlu0 %537 }
 0x1b2   : > { %518 = vst.msk [vmem:[#allocation2 + $0x18] sm:$0xff] %vm515_vm2, %v495_v49 }
 0x1b3   : > { %527 = vst.msk [vmem:[#allocation2 + $0x19] sm:$0x7f] %vm524_vm3, %v465_v36 }
 0x1b4   : > { %560 = vst.msk [vmem:[#allocation2 + $0x17] sm:$0xfe] %vm557_vm4, %v538_v50 }
 0x1b5   : > { %v548_v51 = vpop.permute.xlu1 %547  ;;  %v546_v52 = vpop.permute.xlu0 %545 }
 0x1b6   : > { %565 = vst.msk [vmem:[#allocation2 + $0x3f] sm:$0xfe] %vm557_vm4, %v548_v51  ;;  %564 = vst.msk [vmem:[#allocation2 + $0x37] sm:$0xfe] %vm557_vm4, %v546_v52 }
 0x1b7 PF: > { %v573_v53 = vld [vmem:[%s2017_s3] sm:$0xff]  ;;  %v574_v54 = vld [vmem:[%s2017_s3 + $0x8] sm:$0xf]  ;;  %vm598_vm5 = vcmask 1043456   ;;  %s1225_s15 = sshll.u32 %s1593_s30, 5  ;;  %vm1617_vm6 = vmmov 1  }
 0x1b8   : > { %vm1877_vm7 = vmpackc.low %vm598_vm5, %vm1617_vm6  ;;  %v1325_v56 = vpack.c.bf16 %v574_v54, %v573_v53  ;;  %vm585_vm8 = vcmask 97280   ;;  %v1204_v57 = vld [vmem:[%s2017_s3 + $0x20] sm:$0xff]  ;;  %v1205_v58 = vld [vmem:[%s2017_s3 + $0x28] sm:$0xf]  ;;  %s568_s7 = scalar_lea.vmem [#allocation2], %s1225_s15  ;;  %vm924_vm9 = vcmask 31744  }
 0x1b9   : > { %v1331_v60 = vpack.c.bf16 %v1205_v58, %v1204_v57  ;;  %v1186_v62 = vld [vmem:[%s2017_s3 + $0x10] sm:$0xff]  ;;  %v1187_v63 = vld [vmem:[%s2017_s3 + $0x18] sm:$0xf]  ;;  %v916_v5 = vld [vmem:[%s2019_s5] sm:$0xf]  ;;  %s1219_s17 = sshll.u32 %s1593_s30, 2 }
 0x1ba   : > { %1327 = vmatprep.subr.msk.bf16.mxu0 %vm1877_vm7, %v1325_v56  ;;  %v1319_v0 = vpack.c.bf16 %v1187_v63, %v1186_v62  ;;  %v1211_v10 = vld [vmem:[%s2018_s4] ss:$0 sm:$0xff]  ;;  %s1220_s16 = sshll.u32 %s1597_s8, 3  ;;  %vm1038_vm10 = vcmask 130048   ;;  %s1059_s8 = sshll.u32 %s1817_s10, 4  ;;  %s1945_s8 = int_to_ptr.vmem [resolvable:$true] %s1059_s8 }
 0x1bb   : > { %1330 = vmatpush3.bf16.msk.msra.mxu0 %vm1877_vm7, %v1325_v56  ;;  %v1212_v27 = vld [vmem:[%s2020_s6] ss:$0 sm:$0xff]  ;;  %s1056_s12 = sadd.s32 %s1220_s16, %s1219_s17  ;;  %s2041_s18 = sld [smem:[#allocation13_spill]] }
 0x1bc   : > { %1333 = vmatprep.subr.msk.bf16.mxu0 %vm1877_vm7, %v1331_v60  ;;  %1321 = vmatprep.subr.msk.bf16.mxu1 %vm1877_vm7, %v1319_v0  ;;  %s1221_s30 = sshll.u32 %s1056_s12, 7  ;;  %s1487_s22 = scalar_lea.vmem %s1945_s8, 512 }
 0x1bd   : > { %v569_v59 = vld [vmem:[%s568_s7] sm:$0xff]  ;;  %v570_v61 = vld [vmem:[%s568_s7 + $0x8] sm:$0xff]  ;;  %v571_v1 = vld [vmem:[%s568_s7 + $0x10] sm:$0xff]  ;;  %1324 = vmatpush3.bf16.msk.msra.mxu1 %vm1877_vm7, %v1319_v0  ;;  %p1488_p7 = scmp.ne.s32.totalorder %s1945_s8, %s1487_s22  ;;  %p2042_p2 = scmp.ne.s32.totalorder %s2035_s23, 0 }
 0x1be   : > { %1291 = vmatprep.mubr.msk.f32.mxu0 %vm585_vm8, %v569_v59  ;;  %1281 = vmatprep.mubr.msk.f32.mxu1 %vm585_vm8, %v570_v61  ;;  %v572_v2 = vld [vmem:[%s568_s7 + $0x18] sm:$0xff]  ;;  %v1202_v3 = vld [vmem:[%s568_s7 + $0x20] sm:$0xff]  ;;  %v1203_v4 = vld [vmem:[%s568_s7 + $0x28] sm:$0xff]  ;;  %s1025_s7 = scalar_lea.vmem %s1808_s21, %s1225_s15 [#allocation3]  ;;  %s1618_s20 = smov [#allocation6]  }
 0x1bf   : > { %1292 = vmatmul.mubr.msk.f32.vlgmr.msra.gmra.mrb[0].mxu0 %vm585_vm8, %v570_v61  ;;  %1307 = vmatprep.subr.msk.mxu1 %vm598_vm5, %v916_v5  ;;  %v1027_v29 = vld [vmem:[%s1025_s7 + $0x8] sm:$0xff]  ;;  %v1026_v32 = vld [vmem:[%s1025_s7] sm:$0xff]  ;;  %v1029_v37 = vld [vmem:[%s1025_s7 + $0x18] sm:$0xff]  ;;  %p1489_p4 = pnand %p1488_p7, %p2042_p2  ;;  %s1491_s17 = sshll.u32 %s1618_s20, 4  ;;  %s1492_s17 = int_to_ptr.vmem [resolvable:$false] %s1491_s17 }
 0x1c0   : > { %1336 = vmatpush3.bf16.msk.msra.mxu0 %vm1877_vm7, %v1331_v60  ;;  %1294 = vmatprep.mubr.msk.f32.mxu0 %vm585_vm8, %v571_v1  ;;  %v1028_v41 = vld [vmem:[%s1025_s7 + $0x10] sm:$0xff]  ;;  %s1953_s7 = scalar_lea.sflag [#allocation5], %s308_s13  ;;  %s1493_s16 = scalar_lea.vmem %s1492_s17, 1024 }
 0x1c1   : > { %1282 = vmatmul.mubr.msk.f32.vlgmr.msra.gmra.mrb[0].mxu1 %vm585_vm8, %v571_v1  ;;  %s1943_s19 = scalar_lea.hbm %s2041_s18, %s1221_s30  ;;  %p1490_p0 = pneg %p1489_p4 }
 0x1c2   : > { %1284 = vmatprep.mubr.msk.f32.mxu1 %vm585_vm8, %v572_v2  ;;  %1308 = vmatpush3.msk.msra.mxu1 %vm598_vm5, %v916_v5  ;;  %p1494_p1 = scmp.lt.s32.totalorder %s1945_s8, %s1492_s17  ;;  %p1495_p6 = scmp.lt.s32.totalorder %s1493_s16, %s1487_s22 }
 0x1c3   : > { %1295 = vmatmul.mubr.msk.f32.gmra.mrb[2].mxu0 %vm585_vm8, %v572_v2 }
 0x1c4   : > { %1301 = vmatprep.mubr.msk.f32.mxu0 %vm585_vm8, %v571_v1  ;;  %p1496_p9 = por %p1495_p6, %p1494_p1 }
 0x1c5   : > { %1285 = vmatmul.mubr.msk.f32.gmra.mrb[2].mxu1 %vm585_vm8, %v1202_v3 }
 0x1c6   : > { %p1497_p3 = pnand %p1496_p9, %p1490_p0 }
 0x1c7   : > { %1302 = vmatmul.mubr.msk.f32.vlgmr.msra.gmra.mrb[0].mxu0 %vm585_vm8, %v572_v2 }
 0x1c8   : > { %1304 = vmatprep.mubr.msk.f32.mxu0 %vm585_vm8, %v1202_v3 }
 0x1cb   : > { %1305 = vmatmul.mubr.msk.f32.gmra.mrb[2].mxu0 %vm585_vm8, %v1203_v4 }
 0x294   : > { %v1283_v6 = vpop.f32.mrb[0].mxu1 }
 0x295   : > { %v668_v7 = vpop.f32.mrb[1].mxu1 }
 0x298   : > { %v1286_v8 = vpop.f32.mrb[2].mxu1 }
 0x299   : > { %v678_v11 = vpop.f32.mrb[3].mxu1 }
 0x29a   : > { %v1303_v9 = vpop.f32.mrb[0].mxu0 }
 0x29b   : > { %v1339_v12 = vadd.f32 %v1303_v9, %v1283_v6  ;;  %v878_v13 = vpop.f32.mrb[1].mxu0 }
 0x29c   : > { %v1340_v14 = vadd.f32 %v878_v13, %v668_v7 }
 0x29d   : > { %v909_v15 = vadd.f32 %v1339_v12, %v1211_v10 }
 0x29e   : > { %v908_v16 = vadd.f32 %v1340_v14, %v1211_v10  ;;  %v1306_v17 = vpop.f32.mrb[2].mxu0 }
 0x29f   : > { %v1341_v18 = vadd.f32 %v1306_v17, %v1286_v8  ;;  %v888_v19 = vpop.f32.mrb[3].mxu0  ;;  %v913_v22 = vmax.f32 %v909_v15, 0.0 }
 0x2a0   : > { %v912_v20 = vmax.f32 %v908_v16, 0.0  ;;  %v1342_v21 = vadd.f32 %v888_v19, %v678_v11 }
 0x2a1   : > { %v911_v23 = vadd.f32 %v1341_v18, %v1211_v10 }
 0x2a2   : > { %v910_v24 = vadd.f32 %v1342_v21, %v1211_v10  ;;  %1309 = vmatprep.mubr.msk.f32.mxu1 %vm924_vm9, %v912_v20 }
 0x2a3   : > { %1310 = vmatmul.mubr.msk.f32.vlgmr.msra.gmra.mrb[4].mxu1 %vm924_vm9, %v913_v22  ;;  %v915_v26 = vmax.f32 %v911_v23, 0.0 }
 0x2a4   : > { %v914_v25 = vmax.f32 %v910_v24, 0.0 }
 0x2a6   : > { %1312 = vmatprep.mubr.msk.f32.mxu1 %vm924_vm9, %v914_v25 }
 0x2a7   : > { %1313 = vmatmul.mubr.msk.f32.gmra.mrb[6].mxu1 %vm924_vm9, %v915_v26 }
 0x376   : > { %v1311_v28 = vpop.f32.mrb[4].mxu1 }
 0x377   : > { %v1012_v30 = vadd.f32 %v1311_v28, %v1212_v27  ;;  %v1006_v31 = vpop.f32.mrb[5].mxu1 }
 0x378   : > { %v1007_v33 = vadd.f32 %v1212_v27, %v1006_v31 }
 0x379   : > { %v1031_v34 = vadd.f32 %v1027_v29, %v1012_v30 }
 0x37a   : > { %v1030_v35 = vadd.f32 %v1026_v32, %v1007_v33  ;;  %v1314_v36 = vpop.f32.mrb[6].mxu1 }
 0x37b   : > { %v1035_v38 = vmax.f32 %v1031_v34, 0.0  ;;  %v1022_v39 = vadd.f32 %v1314_v36, %v1212_v27  ;;  %v1016_v40 = vpop.f32.mrb[7].mxu1 }
 0x37c   : > { %v1034_v42 = vmax.f32 %v1030_v35, 0.0  ;;  %v1017_v43 = vadd.f32 %v1212_v27, %v1016_v40 }
 0x37d   : > { %1040 = vst.msk [vmem:[%s1817_s10 + $0x8] sm:$0xff] %vm1038_vm10, %v1035_v38  ;;  %v1033_v44 = vadd.f32 %v1029_v37, %v1022_v39 }
 0x37e   : > { %1039 = vst.msk [vmem:[%s1817_s10] sm:$0xff] %vm1038_vm10, %v1034_v42  ;;  %v1032_v45 = vadd.f32 %v1028_v41, %v1017_v43 }
 0x37f   : > { %v1037_v46 = vmax.f32 %v1033_v44, 0.0 }
 0x380   : > { %v1036_v47 = vmax.f32 %v1032_v45, 0.0 }
 0x381   : > { %1042 = vst.msk [vmem:[%s1817_s10 + $0x18] sm:$0xff] %vm1038_vm10, %v1037_v46 }
 0x382   : > { %1041 = vst.msk [vmem:[%s1817_s10 + $0x10] sm:$0xff] %vm1038_vm10, %v1036_v47 }
 0x383   : > { %1500 = shalt.err (!%p1497_p3)
}
 0x384   : > { %s1501_s13 = scalar_lea.hbm %s1943_s19, 512  ;;  %s1505_s30 = scalar_lea.hbm %s2041_s18, 2048 }
 0x385   : > { %p1502_p11 = scmp.ne.s32.totalorder %s1943_s19, %s1501_s13  ;;  %p1506_p8 = scmp.lt.u32.totalorder %s1943_s19, %s2041_s18 }
 0x386   : > { %p1507_p10 = scmp.lt.u32.totalorder %s1505_s30, %s1501_s13  ;;  %p1509_p7 = scmp.lt.u32.totalorder %s1501_s13, %s1943_s19 }
 0x387   : > { %p1503_p13 = pnand %p1502_p11, %p2042_p2 }
 0x388   : > { %p1508_p12 = por %p1507_p10, %p1506_p8 }
 0x389   : > { %p1504_p5 = pneg %p1503_p13 }
 0x38a   : > { %p1510_p4 = por %p1509_p7, %p1508_p12 }
 0x38c   : > { %p1511_p0 = pnand %p1510_p4, %p1504_p5 }
 0x38e   : > { %1514 = shalt.err (!%p1511_p0)
}
 0x38f   : > { %s1619_s22 = smov 128   ;;  %s1620_s20 = smov 8  }
 0x390   : > { %1349 = dma.vmem_to_hbm [thread:$0]  (%p2042_p2), %s1945_s8, 512, %s1943_s19, %s1953_s7, %s1619_s22, %s1619_s22, %s1620_s20  }
 0x391 PF: > { %p1360_p1 = scmp.ge.s32.totalorder %s1609_s11, 2  ;;  %s1074_s17 = sand.u32 1, %s1569_s24  }
 0x392   : > { %p2043_p6 = scmp.ne.s32.totalorder %s2036_s9, 0  ;;  %s1075_s16 = scalar_lea.sflag [#allocation5], %s1074_s17 }
 0x394   : > { %p1356_p9 = pnand %p1360_p1, %p2043_p6 }
 0x396   : > { %1564 = dma.done.wait (!%p1356_p9), %s1075_s16, 512  }
 0x397   : > { %1566 = vsyncadd (!%p1356_p9), %s1075_s16, 4294966784  ;;  %s23_s11 = sadd.s32 1, %s1609_s11   ;;  %s2044_s23 = smov %s1748_s27 }
 0x398   : > { %p20_p3 = scmp.ge.s32.totalorder %s23_s11, 6   ;;  %s2045_s30 = sld [smem:[#allocation9_spill]] }
 0x399   : > { %s2046_s8 = sld [smem:[#allocation10_spill]]  ;;  %s2047_s9 = sld [smem:[#allocation11_spill]] }
 0x39a   : > { %s2048_s10 = sld [smem:[#allocation12_spill]]  ;;  %s2049_s24 = smov %s1573_s25 }
 0x39b   : > { %s2050_s25 = smov %s1577_s26  ;;  %s2051_s26 = smov %s1751_s14 }
 0x39c   : > { %s2052_s27 = smov %s1585_s28  ;;  %s2053_s28 = smov %s1589_s29 }
 0x39d   : > { %s2054_s29 = smov %s2044_s23  ;;  %22 = sbr.rel (!%p20_p3) target bundleno = 11 (0xb), region = 104 }
 0x3a4   :  { %1080 = vsyncpa [#allocation4], 1 }
 0x3a5   :  { %1082 = vsyncpa [#allocation4 + $0x1], 1 }
 0x3a6   :  { %1083 = vsyncpa [#allocation5], 1 }
 0x3a7   :  { %1085 = vsyncpa [#allocation5 + $0x1], 1 }

</bundles_post_ra>
